<compile_context>
chip_gen: v7x
topology: tpu7x:2x2x1
jax: 0.10.0
libtpu: 0.0.40
codegen_flags: <defaults>
</compile_context>

<pallas_src>
import math

import jax
import jax.numpy as jnp
from jax.experimental import pallas as pl
from jax.experimental.pallas import tpu as pltpu

_LANE = 128
_SUBLANE = 8


def dqn_kernel(x_ref,
               w1_ref, b1_ref,
               w2_ref, b2_ref,
               w3_ref, b3_ref,
               w4_ref, b4_ref,
               o_ref):
    # Fused MLP: relu(x@W1+b1) -> relu(@W2+b2) -> relu(@W3+b3) -> @W4+b4
    # Matmul operands are bf16; accumulate / bias / ReLU in f32.
    x = x_ref[...]                                              # (TB, IN_PAD) bf16

    h = jnp.dot(x, w1_ref[...], preferred_element_type=jnp.float32) + b1_ref[...]
    h = jnp.maximum(h, 0.0)

    h = jnp.dot(h.astype(jnp.bfloat16), w2_ref[...],
                preferred_element_type=jnp.float32) + b2_ref[...]
    h = jnp.maximum(h, 0.0)

    h = jnp.dot(h.astype(jnp.bfloat16), w3_ref[...],
                preferred_element_type=jnp.float32) + b3_ref[...]
    h = jnp.maximum(h, 0.0)

    out = jnp.dot(h.astype(jnp.bfloat16), w4_ref[...],
                  preferred_element_type=jnp.float32) + b4_ref[...]
    o_ref[...] = out.astype(o_ref.dtype)


def _round_up(n, m):
    return ((n + m - 1) // m) * m


def _pad2d(a, rows, cols):
    r, c = a.shape
    return jnp.pad(a, ((0, rows - r), (0, cols - c)))


def dqn_forward(x, params, *, tb=512):
    """x: (B, input_dim) float32; params: list of (W, b) with W as (in, out).

    Returns (B, output_dim) float32.
    """
    B, input_dim = x.shape
    out_dim = params[-1][0].shape[1]

    # ----- padded, lane/sublane-friendly shapes (one-time host-side cost) ----
    in_pad = _round_up(input_dim, _SUBLANE)          # 4 -> 8
    dims = [in_pad]
    for (w, _) in params:
        dims.append(_round_up(w.shape[1], _LANE))    # 16/32/32/out -> 128

    padded = []
    prev = in_pad
    for (w, b) in params:
        kout = _round_up(w.shape[1], _LANE)
        w_p = _pad2d(w, prev, kout).astype(jnp.bfloat16)       # zero-padded rows/cols
        b_p = _pad2d(b.reshape(1, -1), 1, kout).astype(jnp.float32)
        padded.append((w_p, b_p))
        prev = kout
    out_pad = prev

    # ----- batch tiling ------------------------------------------------------
    TB = min(tb, max(_SUBLANE, _round_up(B, _SUBLANE)))
    B_pad = _round_up(max(B, TB), TB)
    x_p = _pad2d(x, B_pad, in_pad).astype(jnp.bfloat16)

    grid = (B_pad // TB,)

    in_specs = [pl.BlockSpec((TB, in_pad), lambda i: (i, 0))]
    flat_params = []
    for (w_p, b_p) in padded:
        in_specs.append(pl.BlockSpec(w_p.shape, lambda i: (0, 0)))   # resident
        in_specs.append(pl.BlockSpec(b_p.shape, lambda i: (0, 0)))   # resident
        flat_params.append(w_p)
        flat_params.append(b_p)

    out = pl.pallas_call(
        dqn_kernel,
        out_shape=jax.ShapeDtypeStruct((B_pad, out_pad), jnp.float32),
        grid=grid,
        in_specs=in_specs,
        out_specs=pl.BlockSpec((TB, out_pad), lambda i: (i, 0)),
        compiler_params=pltpu.CompilerParams(
            dimension_semantics=("parallel",),
            vmem_limit_bytes=32 * 1024 * 1024,
        ),
    )(x_p, *flat_params)

    return out[:B, :out_dim]


def init_linear(key, fan_in, fan_out):
    """Deterministic init mimicking PyTorch nn.Linear default (uniform +/- 1/sqrt(fan_in)).
    Weight stored as (in, out) so the kernel computes x @ W."""
    kw, kb = jax.random.split(key)
    bound = 1.0 / math.sqrt(fan_in)
    w = jax.random.uniform(kw, (fan_in, fan_out), jnp.float32, -bound, bound)
    b = jax.random.uniform(kb, (1, fan_out), jnp.float32, -bound, bound)
    return w, b


def dqn_reference(x, params):
    h = x
    for (w, b) in params[:-1]:
        h = jnp.maximum(h @ w + b, 0.0)
    w, b = params[-1]
    return h @ w + b


if __name__ == "__main__":
    key = jax.random.PRNGKey(0)
    input_dim = 4   # CartPole observation dim
    output_dim = 2  # CartPole action dim
    batch = 8

    kx, k1, k2, k3, k4 = jax.random.split(key, 5)
    x = jax.random.normal(kx, (batch, input_dim), jnp.float32)

    params = [
        init_linear(k1, input_dim, 16),
        init_linear(k2, 16, 32),
        init_linear(k3, 32, 32),
        init_linear(k4, 32, output_dim),
    ]

    out = dqn_forward(x, params)
    out = jax.block_until_ready(out)

    ref = dqn_reference(x, params)
    assert out.shape == (batch, output_dim), out.shape
    # bf16 matmul operands with f32 accumulation -> loosen tolerance vs f32 ref.
    assert jnp.allclose(out, ref, atol=5e-2, rtol=5e-2), (
        float(jnp.max(jnp.abs(out - ref))))

    print("KERNEL_OK")
</pallas_src>

<mosaic_0001>
module attributes {stable_mosaic.version = 11 : i64} {
  func.func @dqn_kernel(%arg0: i32, %arg1: memref<8x8xbf16, #tpu.memory_space<vmem>>, %arg2: memref<8x128xbf16, #tpu.memory_space<vmem>>, %arg3: memref<1x128xf32, #tpu.memory_space<vmem>>, %arg4: memref<128x128xbf16, #tpu.memory_space<vmem>>, %arg5: memref<1x128xf32, #tpu.memory_space<vmem>>, %arg6: memref<128x128xbf16, #tpu.memory_space<vmem>>, %arg7: memref<1x128xf32, #tpu.memory_space<vmem>>, %arg8: memref<128x128xbf16, #tpu.memory_space<vmem>>, %arg9: memref<1x128xf32, #tpu.memory_space<vmem>>, %arg10: memref<8x128xf32, #tpu.memory_space<vmem>>) attributes {dimension_semantics = [#tpu.dimension_semantics<parallel>], iteration_bounds = array<i64: 1>, scalar_prefetch = 0 : i64, scratch_operands = 0 : i64, tpu.core_type = #tpu.core_type<tc>, window_params = [{transform_indices = @transform_0, window_bounds = array<i64: 8, 8>}, {pipeline_mode = #tpu.pipeline_mode<synchronous>, transform_indices = @transform_1, window_bounds = array<i64: 8, 128>}, {pipeline_mode = #tpu.pipeline_mode<synchronous>, transform_indices = @transform_2, window_bounds = array<i64: 1, 128>}, {pipeline_mode = #tpu.pipeline_mode<synchronous>, transform_indices = @transform_3, window_bounds = array<i64: 128, 128>}, {pipeline_mode = #tpu.pipeline_mode<synchronous>, transform_indices = @transform_4, window_bounds = array<i64: 1, 128>}, {pipeline_mode = #tpu.pipeline_mode<synchronous>, transform_indices = @transform_5, window_bounds = array<i64: 128, 128>}, {pipeline_mode = #tpu.pipeline_mode<synchronous>, transform_indices = @transform_6, window_bounds = array<i64: 1, 128>}, {pipeline_mode = #tpu.pipeline_mode<synchronous>, transform_indices = @transform_7, window_bounds = array<i64: 128, 128>}, {pipeline_mode = #tpu.pipeline_mode<synchronous>, transform_indices = @transform_8, window_bounds = array<i64: 1, 128>}, {transform_indices = @transform_9, window_bounds = array<i64: 8, 128>}]} {
    %c0 = arith.constant 0 : index
    %c0_0 = arith.constant 0 : index
    %0 = vector.load %arg1[%c0, %c0_0] : memref<8x8xbf16, #tpu.memory_space<vmem>>, vector<8x8xbf16>
    %c0_1 = arith.constant 0 : index
    %c0_2 = arith.constant 0 : index
    %1 = vector.load %arg2[%c0_1, %c0_2] : memref<8x128xbf16, #tpu.memory_space<vmem>>, vector<8x128xbf16>
    %cst = arith.constant dense<0.000000e+00> : vector<8x128xf32>
    %2 = tpu.matmul %0, %1, %cst {dimension_numbers = #tpu.dot_dimension_numbers<[1], [0], [0], [1], [0, 0, 1, 1], [], []>} : vector<8x8xbf16>, vector<8x128xbf16>, vector<8x128xf32> -> vector<8x128xf32>
    %c0_3 = arith.constant 0 : index
    %c0_4 = arith.constant 0 : index
    %3 = vector.load %arg3[%c0_3, %c0_4] : memref<1x128xf32, #tpu.memory_space<vmem>>, vector<1x128xf32>
    %4 = vector.broadcast %3 : vector<1x128xf32> to vector<8x128xf32>
    %5 = arith.addf %2, %4 : vector<8x128xf32>
    %cst_5 = arith.constant 0.000000e+00 : f32
    %6 = vector.broadcast %cst_5 : f32 to vector<8x128xf32>
    %7 = arith.maximumf %5, %6 : vector<8x128xf32>
    %8 = arith.truncf %7 : vector<8x128xf32> to vector<8x128xbf16>
    %c0_6 = arith.constant 0 : index
    %c0_7 = arith.constant 0 : index
    %9 = vector.load %arg4[%c0_6, %c0_7] : memref<128x128xbf16, #tpu.memory_space<vmem>>, vector<128x128xbf16>
    %cst_8 = arith.constant dense<0.000000e+00> : vector<8x128xf32>
    %10 = tpu.matmul %8, %9, %cst_8 {dimension_numbers = #tpu.dot_dimension_numbers<[1], [0], [0], [1], [0, 0, 1, 1], [], []>} : vector<8x128xbf16>, vector<128x128xbf16>, vector<8x128xf32> -> vector<8x128xf32>
    %c0_9 = arith.constant 0 : index
    %c0_10 = arith.constant 0 : index
    %11 = vector.load %arg5[%c0_9, %c0_10] : memref<1x128xf32, #tpu.memory_space<vmem>>, vector<1x128xf32>
    %12 = vector.broadcast %11 : vector<1x128xf32> to vector<8x128xf32>
    %13 = arith.addf %10, %12 : vector<8x128xf32>
    %cst_11 = arith.constant 0.000000e+00 : f32
    %14 = vector.broadcast %cst_11 : f32 to vector<8x128xf32>
    %15 = arith.maximumf %13, %14 : vector<8x128xf32>
    %16 = arith.truncf %15 : vector<8x128xf32> to vector<8x128xbf16>
    %c0_12 = arith.constant 0 : index
    %c0_13 = arith.constant 0 : index
    %17 = vector.load %arg6[%c0_12, %c0_13] : memref<128x128xbf16, #tpu.memory_space<vmem>>, vector<128x128xbf16>
    %cst_14 = arith.constant dense<0.000000e+00> : vector<8x128xf32>
    %18 = tpu.matmul %16, %17, %cst_14 {dimension_numbers = #tpu.dot_dimension_numbers<[1], [0], [0], [1], [0, 0, 1, 1], [], []>} : vector<8x128xbf16>, vector<128x128xbf16>, vector<8x128xf32> -> vector<8x128xf32>
    %c0_15 = arith.constant 0 : index
    %c0_16 = arith.constant 0 : index
    %19 = vector.load %arg7[%c0_15, %c0_16] : memref<1x128xf32, #tpu.memory_space<vmem>>, vector<1x128xf32>
    %20 = vector.broadcast %19 : vector<1x128xf32> to vector<8x128xf32>
    %21 = arith.addf %18, %20 : vector<8x128xf32>
    %cst_17 = arith.constant 0.000000e+00 : f32
    %22 = vector.broadcast %cst_17 : f32 to vector<8x128xf32>
    %23 = arith.maximumf %21, %22 : vector<8x128xf32>
    %24 = arith.truncf %23 : vector<8x128xf32> to vector<8x128xbf16>
    %c0_18 = arith.constant 0 : index
    %c0_19 = arith.constant 0 : index
    %25 = vector.load %arg8[%c0_18, %c0_19] : memref<128x128xbf16, #tpu.memory_space<vmem>>, vector<128x128xbf16>
    %cst_20 = arith.constant dense<0.000000e+00> : vector<8x128xf32>
    %26 = tpu.matmul %24, %25, %cst_20 {dimension_numbers = #tpu.dot_dimension_numbers<[1], [0], [0], [1], [0, 0, 1, 1], [], []>} : vector<8x128xbf16>, vector<128x128xbf16>, vector<8x128xf32> -> vector<8x128xf32>
    %c0_21 = arith.constant 0 : index
    %c0_22 = arith.constant 0 : index
    %27 = vector.load %arg9[%c0_21, %c0_22] : memref<1x128xf32, #tpu.memory_space<vmem>>, vector<1x128xf32>
    %28 = vector.broadcast %27 : vector<1x128xf32> to vector<8x128xf32>
    %29 = arith.addf %26, %28 : vector<8x128xf32>
    %c0_23 = arith.constant 0 : index
    %c0_24 = arith.constant 0 : index
    %30 = vector.load %arg10[%c0_23, %c0_24] : memref<8x128xf32, #tpu.memory_space<vmem>>, vector<8x128xf32>
    tpu.vector_store %arg10[%c0_23, %c0_24], %29 {strides = array<i32>} : memref<8x128xf32, #tpu.memory_space<vmem>>, vector<8x128xf32>,
    return
  }
  func.func @transform_0(%arg0: i32) -> (i32, i32) {
    %c0_i32 = arith.constant 0 : i32
    %c0_i32_0 = arith.constant 0 : i32
    return %arg0, %c0_i32 : i32, i32
  }
  func.func @transform_1(%arg0: i32) -> (i32, i32) {
    %c0_i32 = arith.constant 0 : i32
    %c0_i32_0 = arith.constant 0 : i32
    %c0_i32_1 = arith.constant 0 : i32
    return %c0_i32, %c0_i32_0 : i32, i32
  }
  func.func @transform_2(%arg0: i32) -> (i32, i32) {
    %c0_i32 = arith.constant 0 : i32
    %c0_i32_0 = arith.constant 0 : i32
    %c0_i32_1 = arith.constant 0 : i32
    return %c0_i32, %c0_i32_0 : i32, i32
  }
  func.func @transform_3(%arg0: i32) -> (i32, i32) {
    %c0_i32 = arith.constant 0 : i32
    %c0_i32_0 = arith.constant 0 : i32
    %c0_i32_1 = arith.constant 0 : i32
    return %c0_i32, %c0_i32_0 : i32, i32
  }
  func.func @transform_4(%arg0: i32) -> (i32, i32) {
    %c0_i32 = arith.constant 0 : i32
    %c0_i32_0 = arith.constant 0 : i32
    %c0_i32_1 = arith.constant 0 : i32
    return %c0_i32, %c0_i32_0 : i32, i32
  }
  func.func @transform_5(%arg0: i32) -> (i32, i32) {
    %c0_i32 = arith.constant 0 : i32
    %c0_i32_0 = arith.constant 0 : i32
    %c0_i32_1 = arith.constant 0 : i32
    return %c0_i32, %c0_i32_0 : i32, i32
  }
  func.func @transform_6(%arg0: i32) -> (i32, i32) {
    %c0_i32 = arith.constant 0 : i32
    %c0_i32_0 = arith.constant 0 : i32
    %c0_i32_1 = arith.constant 0 : i32
    return %c0_i32, %c0_i32_0 : i32, i32
  }
  func.func @transform_7(%arg0: i32) -> (i32, i32) {
    %c0_i32 = arith.constant 0 : i32
    %c0_i32_0 = arith.constant 0 : i32
    %c0_i32_1 = arith.constant 0 : i32
    return %c0_i32, %c0_i32_0 : i32, i32
  }
  func.func @transform_8(%arg0: i32) -> (i32, i32) {
    %c0_i32 = arith.constant 0 : i32
    %c0_i32_0 = arith.constant 0 : i32
    %c0_i32_1 = arith.constant 0 : i32
    return %c0_i32, %c0_i32_0 : i32, i32
  }
  func.func @transform_9(%arg0: i32) -> (i32, i32) {
    %c0_i32 = arith.constant 0 : i32
    %c0_i32_0 = arith.constant 0 : i32
    return %arg0, %c0_i32 : i32, i32
  }
}

</mosaic_0001>

<bundles_post_ra>
// kernel: tpu_custom_call.1
= control target key start
LH: loop header
LB: loop body
LE: loop exit
PB: predicated region body
PF: predicated region fallthrough
CT: control target
= control target key end

     0   :  { %14 = vsyncpa [#allocation3], 0  ;;  %s996_s0 = inlined_call_operand.hbm [shape: bf16[8,8], index: 0, kind: input, shape index: {}]   ;;  %s997_s1 = inlined_call_operand.hbm [shape: bf16[8,128], index: 1, kind: input, shape index: {}]   ;;  %s998_s2 = inlined_call_operand.vmem [shape: f32[1,128], index: 2, kind: input, shape index: {}]   ;;  %s999_s3 = inlined_call_operand.hbm [shape: bf16[128,128], index: 3, kind: input, shape index: {}]   ;;  %s1000_s4 = inlined_call_operand.vmem [shape: f32[1,128], index: 4, kind: input, shape index: {}]   ;;  %s1001_s5 = inlined_call_operand.hbm [shape: bf16[128,128], index: 5, kind: input, shape index: {}]   ;;  %s1002_s6 = inlined_call_operand.vmem [shape: f32[1,128], index: 6, kind: input, shape index: {}]   ;;  %s1003_s7 = inlined_call_operand.hbm [shape: bf16[128,128], index: 7, kind: input, shape index: {}]   ;;  %s1004_s8 = inlined_call_operand.vmem [shape: f32[1,128], index: 8, kind: input, shape index: {}]   ;;  %s1005_s9 = inlined_call_operand.hbm [shape: f32[8,128], index: 9, kind: output, shape index: {}]  }
   0x1   :  { %15 = vsyncpa [#allocation6], 0 }
   0x2   :  { %16 = vsyncpa [#allocation9], 0 }
   0x3   :  { %17 = vsyncpa [#allocation4], 0  ;;  %s810_s30 = smov [#allocation5]   ;;  %s670_s13 = scalar_lea.hbm %s997_s1, 64 }
   0x4   :  { %s34_s10 = sshll.u32 %s810_s30, 4  ;;  %p671_p0 = scmp.ne.s32.totalorder %s997_s1, %s670_s13  ;;  %s35_s10 = int_to_ptr.vmem [resolvable:$true] %s34_s10 }
   0x5   :  { %p674_p1 = scmp.lt.u32.totalorder %s670_s13, %s997_s1 }
   0x7   :  { %p676_p2 = pnand %p674_p1, %p671_p0 }
   0x9   :  { %679 = shalt.err (!%p676_p2)
}
   0xa   :  { %s680_s18 = scalar_lea.vmem %s35_s10, 64  ;;  %p685_p4 = scmp.lt.s32.totalorder %s35_s10, %s35_s10 }
   0xb   :  { %p681_p3 = scmp.ne.s32.totalorder %s35_s10, %s680_s18  ;;  %p686_p5 = scmp.lt.s32.totalorder %s680_s18, %s680_s18 }
   0xd   :  { %p687_p6 = por %p686_p5, %p685_p4 }
   0xf   :  { %p688_p7 = pnand %p687_p6, %p681_p3 }
  0x11   :  { %691 = shalt.err (!%p688_p7)
}
  0x12   :  { %37 = dma.hbm_to_vmem [thread:$0]  %s997_s1, 64, %s35_s10, [#allocation6]  }
  0x13   :  { %s811_s21 = smov [#allocation8]   ;;  %s812_s23 = smov [#allocation2]  }
  0x14   :  { %s59_s22 = sshll.u32 %s811_s21, 4  ;;  %s24_s24 = sshll.u32 %s812_s23, 4  ;;  %s60_s22 = int_to_ptr.vmem [resolvable:$true] %s59_s22  ;;  %s25_s24 = int_to_ptr.vmem [resolvable:$true] %s24_s24 }
  0x15   :  { %s692_s27 = scalar_lea.hbm %s1001_s5, 1024 }
  0x16   :  { %p693_p8 = scmp.ne.s32.totalorder %s1001_s5, %s692_s27  ;;  %p696_p9 = scmp.lt.u32.totalorder %s692_s27, %s1001_s5 }
  0x18   :  { %p698_p10 = pnand %p696_p9, %p693_p8 }
  0x1a   :  { %701 = shalt.err (!%p698_p10)
}
  0x1b   :  { %s702_s1 = scalar_lea.vmem %s60_s22, 1024  ;;  %p707_p12 = scmp.lt.s32.totalorder %s60_s22, %s60_s22 }
  0x1c   :  { %p703_p11 = scmp.ne.s32.totalorder %s60_s22, %s702_s1  ;;  %p708_p13 = scmp.lt.s32.totalorder %s702_s1, %s702_s1 }
  0x1e   :  { %p709_p0 = por %p708_p13, %p707_p12 }
  0x20   :  { %p710_p1 = pnand %p709_p0, %p703_p11 }
  0x22   :  { %713 = shalt.err (!%p710_p1)
}
  0x23   :  { %s813_s10 = smov 64   ;;  %s814_s12 = smov 4  }
  0x24   :  { %65 = dma.hbm_to_vmem [thread:$0]  %s1001_s5, 1024, %s60_s22, [#allocation9], %s813_s10, %s813_s10, %s814_s12  }
  0x25   :  { %s714_s17 = scalar_lea.hbm %s996_s0, 64 }
  0x26   :  { %p715_p2 = scmp.ne.s32.totalorder %s996_s0, %s714_s17  ;;  %p718_p3 = scmp.lt.u32.totalorder %s714_s17, %s996_s0 }
  0x28   :  { %p720_p4 = pnand %p718_p3, %p715_p2 }
  0x2a   :  { %723 = shalt.err (!%p720_p4)
}
  0x2b   :  { %s724_s23 = scalar_lea.vmem %s25_s24, 64  ;;  %p729_p6 = scmp.lt.s32.totalorder %s25_s24, %s25_s24 }
  0x2c   :  { %p725_p5 = scmp.ne.s32.totalorder %s25_s24, %s724_s23  ;;  %p730_p7 = scmp.lt.s32.totalorder %s724_s23, %s724_s23 }
  0x2e   :  { %p731_p8 = por %p730_p7, %p729_p6 }
  0x30   :  { %p732_p9 = pnand %p731_p8, %p725_p5 }
  0x32   :  { %735 = shalt.err (!%p732_p9)
}
  0x33   :  { %27 = dma.hbm_to_vmem [thread:$0]  %s996_s0, 64, %s25_s24, [#allocation3]  }
  0x34   :  { %s815_s25 = smov [#allocation7]   ;;  %s816_s27 = smov [#allocation10]  }
  0x35   :  { %s45_s26 = sshll.u32 %s815_s25, 4  ;;  %s73_s28 = sshll.u32 %s816_s27, 4  ;;  %s46_s26 = int_to_ptr.vmem [resolvable:$true] %s45_s26  ;;  %s74_s28 = int_to_ptr.vmem [resolvable:$true] %s73_s28 }
  0x36   :  { %s736_s11 = scalar_lea.hbm %s999_s3, 1024 }
  0x37   :  { %p737_p10 = scmp.ne.s32.totalorder %s999_s3, %s736_s11  ;;  %p740_p11 = scmp.lt.u32.totalorder %s736_s11, %s999_s3 }
  0x39   :  { %p742_p12 = pnand %p740_p11, %p737_p10 }
  0x3b   :  { %745 = shalt.err (!%p742_p12)
}
  0x3c   :  { %s746_s0 = scalar_lea.vmem %s46_s26, 1024  ;;  %p751_p0 = scmp.lt.s32.totalorder %s46_s26, %s46_s26 }
  0x3d   :  { %p747_p13 = scmp.ne.s32.totalorder %s46_s26, %s746_s0  ;;  %p752_p1 = scmp.lt.s32.totalorder %s746_s0, %s746_s0 }
  0x3f   :  { %p753_p2 = por %p752_p1, %p751_p0 }
  0x41   :  { %p754_p3 = pnand %p753_p2, %p747_p13 }
  0x43   :  { %757 = shalt.err (!%p754_p3)
}
  0x44   :  { %51 = dma.hbm_to_vmem [thread:$0]  %s999_s3, 1024, %s46_s26, [#allocation6], %s813_s10, %s813_s10, %s814_s12  }
  0x45   :  { %s758_s19 = scalar_lea.hbm %s1003_s7, 1024 }
  0x46   :  { %p759_p4 = scmp.ne.s32.totalorder %s1003_s7, %s758_s19  ;;  %p762_p5 = scmp.lt.u32.totalorder %s758_s19, %s1003_s7 }
  0x48   :  { %p764_p6 = pnand %p762_p5, %p759_p4 }
  0x4a   :  { %767 = shalt.err (!%p764_p6)
}
  0x4b   :  { %s768_s22 = scalar_lea.vmem %s74_s28, 1024  ;;  %p773_p8 = scmp.lt.s32.totalorder %s74_s28, %s74_s28 }
  0x4c   :  { %p769_p7 = scmp.ne.s32.totalorder %s74_s28, %s768_s22  ;;  %p774_p9 = scmp.lt.s32.totalorder %s768_s22, %s768_s22 }
  0x4e   :  { %p775_p10 = por %p774_p9, %p773_p8 }
  0x50   :  { %p776_p11 = pnand %p775_p10, %p769_p7 }
  0x52   :  { %779 = shalt.err (!%p776_p11)
}
  0x53   :  { %79 = dma.hbm_to_vmem [thread:$0]  %s1003_s7, 1024, %s74_s28, [#allocation9], %s813_s10, %s813_s10, %s814_s12  }
  0x54   :  { %802 = dma.done.wait [#allocation3], 64  }
  0x55   :  { %803 = vsyncadd [#allocation3], 4294967232 }
  0x56   :  { %804 = dma.done.wait [#allocation6], 1088  }
  0x57   :  { %805 = vsyncadd [#allocation6], 4294966208 }
  0x58   :  { %806 = dma.done.wait [#allocation9], 2048  }
  0x59   :  { %807 = vsyncadd [#allocation9], 4294965248  ;;  %v817_v0 = vmov 0.0   ;;  %vm818_vm0 = vmmov 0   ;;  %vm111_vm1 = vcmask 1043456   ;;  %vm107_vm2 = vcmask 64512  }
  0x5a   :  { %570 = vmatprep.subr.bf16.mxu0 %v817_v0  ;;  %572 = vmatprep.mubr.msk.bf16.mxu0 %vm818_vm0, %v817_v0  ;;  %v99_v1 = vld [vmem:[#allocation5] sm:$0xf]  ;;  %v646_v3 = vld [vmem:[#allocation7] sm:$0xff]   ;;  %v98_v4 = vld [vmem:[#allocation2] sm:$0xf]  ;;  %s819_s29 = smov [#allocation11]  }
  0x5b   :  { %576 = vmatprep.subr.bf16.mxu1 %v817_v0  ;;  %592 = vmatprep.mubr.msk.bf16.mxu1 %vm818_vm0, %v817_v0  ;;  %v113_v2 = vsel %vm111_vm1, %v99_v1, 0  ;;  %v647_v5 = vld [vmem:[#allocation7 + $0x8] sm:$0xff]   ;;  %v648_v6 = vld [vmem:[#allocation7 + $0x10] sm:$0xff]   ;;  %v649_v7 = vld [vmem:[#allocation7 + $0x18] sm:$0xff]   ;;  %s501_s30 = sshll.u32 %s819_s29, 4  ;;  %s502_s30 = int_to_ptr.vmem [resolvable:$true] %s501_s30 }
  0x5c   :  { %571 = vmatpush3.bf16.msra.mxu0 %v113_v2  ;;  %577 = vmatpush3.bf16.msra.mxu1 %v646_v3  ;;  %v650_v8 = vld [vmem:[#allocation7 + $0x20] sm:$0xff]   ;;  %v651_v9 = vld [vmem:[#allocation7 + $0x28] sm:$0xff]   ;;  %v652_v10 = vld [vmem:[#allocation7 + $0x30] sm:$0xff]   ;;  %p785_p13 = scmp.lt.s32.totalorder %s502_s30, %s502_s30 }
  0x5d   :  { %596 = vmatprep.subr.bf16.mxu0 %v817_v0  ;;  %578 = vmatprep.subr.bf16.mxu1 %v817_v0  ;;  %v653_v11 = vld [vmem:[#allocation7 + $0x38] sm:$0xff]   ;;  %v654_v12 = vld [vmem:[#allocation8] sm:$0xff]   ;;  %v655_v13 = vld [vmem:[#allocation8 + $0x8] sm:$0xff]  }
  0x5e   :  { %v656_v14 = vld [vmem:[#allocation8 + $0x10] sm:$0xff]   ;;  %v657_v15 = vld [vmem:[#allocation8 + $0x18] sm:$0xff]   ;;  %v658_v16 = vld [vmem:[#allocation8 + $0x20] sm:$0xff]  }
  0x5f   :  { %573 = vmatmul.mubr.msk.bf16.vlgmr.msra.gmra.mrb[0].mxu0 %vm107_vm2, %v98_v4  ;;  %v659_v17 = vld [vmem:[#allocation8 + $0x28] sm:$0xff]   ;;  %v512_v18 = vld [vmem:[%s998_s2] ss:$0 sm:$0xff]  ;;  %v660_v26 = vld [vmem:[#allocation8 + $0x30] sm:$0xff]  }
  0x60   :  { %612 = vmatprep.mubr.msk.bf16.mxu0 %vm818_vm0, %v817_v0  ;;  %579 = vmatpush3.bf16.msra.mxu1 %v647_v5  ;;  %v661_v27 = vld [vmem:[#allocation8 + $0x38] sm:$0xff]   ;;  %v662_v28 = vld [vmem:[#allocation10] sm:$0xff]   ;;  %v663_v29 = vld [vmem:[#allocation10 + $0x8] sm:$0xff]  }
  0x61   :  { %580 = vmatprep.subr.bf16.mxu1 %v817_v0  ;;  %597 = vmatpush3.bf16.msra.mxu0 %v654_v12  ;;  %v664_v30 = vld [vmem:[#allocation10 + $0x10] sm:$0xff]   ;;  %v665_v31 = vld [vmem:[#allocation10 + $0x18] sm:$0xff]   ;;  %v666_v32 = vld [vmem:[#allocation10 + $0x20] sm:$0xff]  }
  0x62   :  { %598 = vmatprep.subr.bf16.mxu0 %v817_v0  ;;  %v667_v33 = vld [vmem:[#allocation10 + $0x28] sm:$0xff]   ;;  %v514_v34 = vld [vmem:[%s1000_s4] ss:$0 sm:$0xff]  ;;  %v668_v42 = vld [vmem:[#allocation10 + $0x30] sm:$0xff]  }
  0x63   :  { %v669_v43 = vld [vmem:[#allocation10 + $0x38] sm:$0xff]  }
  0x64   :  { %581 = vmatpush3.bf16.msra.mxu1 %v648_v6  ;;  %v523_v44 = vld [vmem:[%s1002_s6] ss:$0 sm:$0xff]  ;;  %s780_s6 = scalar_lea.vmem %s502_s30, 128 }
  0x65   :  { %582 = vmatprep.subr.bf16.mxu1 %v817_v0  ;;  %599 = vmatpush3.bf16.msra.mxu0 %v655_v13  ;;  %v532_v52 = vld [vmem:[%s1004_s8] ss:$0 sm:$0xff]  ;;  %p781_p12 = scmp.ne.s32.totalorder %s502_s30, %s780_s6  ;;  %p786_p0 = scmp.lt.s32.totalorder %s780_s6, %s780_s6 }
  0x66   :  { %600 = vmatprep.subr.bf16.mxu0 %v817_v0 }
  0x67   :  { %p787_p1 = por %p786_p0, %p785_p13 }
  0x68   :  { %583 = vmatpush3.bf16.msra.mxu1 %v649_v7 }
  0x69   :  { %584 = vmatprep.subr.bf16.mxu1 %v817_v0  ;;  %601 = vmatpush3.bf16.msra.mxu0 %v656_v14  ;;  %p788_p2 = pnand %p787_p1, %p781_p12 }
  0x6a   :  { %602 = vmatprep.subr.bf16.mxu0 %v817_v0 }
  0x6c   :  { %585 = vmatpush3.bf16.msra.mxu1 %v650_v8 }
  0x6d   :  { %586 = vmatprep.subr.bf16.mxu1 %v817_v0  ;;  %603 = vmatpush3.bf16.msra.mxu0 %v657_v15 }
  0x6e   :  { %604 = vmatprep.subr.bf16.mxu0 %v817_v0 }
  0x70   :  { %587 = vmatpush3.bf16.msra.mxu1 %v651_v9 }
  0x71   :  { %588 = vmatprep.subr.bf16.mxu1 %v817_v0  ;;  %605 = vmatpush3.bf16.msra.mxu0 %v658_v16 }
  0x72   :  { %606 = vmatprep.subr.bf16.mxu0 %v817_v0 }
  0x74   :  { %589 = vmatpush3.bf16.msra.mxu1 %v652_v10 }
  0x75   :  { %590 = vmatprep.subr.bf16.mxu1 %v817_v0  ;;  %607 = vmatpush3.bf16.msra.mxu0 %v659_v17 }
  0x76   :  { %608 = vmatprep.subr.bf16.mxu0 %v817_v0 }
  0x78   :  { %591 = vmatpush3.bf16.msra.mxu1 %v653_v11 }
  0x79   :  { %616 = vmatprep.subr.bf16.mxu1 %v817_v0  ;;  %609 = vmatpush3.bf16.msra.mxu0 %v660_v26 }
  0x7a   :  { %610 = vmatprep.subr.bf16.mxu0 %v817_v0 }
  0x7d   :  { %611 = vmatpush3.bf16.msra.mxu0 %v661_v27 }
 0x132   :  { %v149_v19 = vpop.f32.mrb[0].mxu0 }
 0x133   :  { %v150_v20 = vadd.f32 %v512_v18, %v149_v19  ;;  %v574_v21 = vpop.f32.mrb[1].mxu0 }
 0x134   :  { %v152_v22 = vpop.f32.mrb[2].mxu0 }
 0x135   :  { %v155_v23 = vmax.f32 %v150_v20, 0.0  ;;  %v575_v24 = vpop.f32.mrb[3].mxu0 }
 0x137   :  { %v156_v25 = vpack.c.bf16 %v155_v23, %v155_v23 }
 0x139   :  { %593 = vmatmul.mubr.bf16.vlgmr.msra.gmra.mrb[0].mxu1 %v156_v25 }
 0x13a   :  { %632 = vmatprep.mubr.msk.bf16.mxu1 %vm818_vm0, %v817_v0  ;;  %617 = vmatpush3.bf16.msra.mxu1 %v662_v28 }
 0x13b   :  { %618 = vmatprep.subr.bf16.mxu1 %v817_v0 }
 0x13e   :  { %619 = vmatpush3.bf16.msra.mxu1 %v663_v29 }
 0x13f   :  { %620 = vmatprep.subr.bf16.mxu1 %v817_v0 }
 0x142   :  { %621 = vmatpush3.bf16.msra.mxu1 %v664_v30 }
 0x143   :  { %622 = vmatprep.subr.bf16.mxu1 %v817_v0 }
 0x146   :  { %623 = vmatpush3.bf16.msra.mxu1 %v665_v31 }
 0x147   :  { %624 = vmatprep.subr.bf16.mxu1 %v817_v0 }
 0x14a   :  { %625 = vmatpush3.bf16.msra.mxu1 %v666_v32 }
 0x14b   :  { %626 = vmatprep.subr.bf16.mxu1 %v817_v0 }
 0x14e   :  { %627 = vmatpush3.bf16.msra.mxu1 %v667_v33 }
 0x14f   :  { %628 = vmatprep.subr.bf16.mxu1 %v817_v0 }
 0x152   :  { %629 = vmatpush3.bf16.msra.mxu1 %v668_v42 }
 0x153   :  { %630 = vmatprep.subr.bf16.mxu1 %v817_v0 }
 0x156   :  { %631 = vmatpush3.bf16.msra.mxu1 %v669_v43 }
 0x20c   :  { %v262_v35 = vpop.f32.mrb[0].mxu1 }
 0x20d   :  { %v263_v36 = vadd.f32 %v514_v34, %v262_v35  ;;  %v594_v37 = vpop.f32.mrb[1].mxu1 }
 0x20e   :  { %v265_v38 = vpop.f32.mrb[2].mxu1 }
 0x20f   :  { %v268_v39 = vmax.f32 %v263_v36, 0.0  ;;  %v595_v40 = vpop.f32.mrb[3].mxu1 }
 0x211   :  { %v269_v41 = vpack.c.bf16 %v268_v39, %v268_v39 }
 0x213   :  { %613 = vmatmul.mubr.bf16.vlgmr.msra.gmra.mrb[4].mxu0 %v269_v41 }
 0x2e6   :  { %v375_v45 = vpop.f32.mrb[4].mxu0 }
 0x2e7   :  { %v376_v46 = vadd.f32 %v523_v44, %v375_v45  ;;  %v614_v47 = vpop.f32.mrb[5].mxu0 }
 0x2e8   :  { %v378_v48 = vpop.f32.mrb[6].mxu0 }
 0x2e9   :  { %v381_v49 = vmax.f32 %v376_v46, 0.0  ;;  %v615_v50 = vpop.f32.mrb[7].mxu0 }
 0x2eb   :  { %v382_v51 = vpack.c.bf16 %v381_v49, %v381_v49 }
 0x2ed   :  { %633 = vmatmul.mubr.bf16.vlgmr.msra.gmra.mrb[4].mxu1 %v382_v51 }
 0x3c0   :  { %v488_v53 = vpop.f32.mrb[4].mxu1 }
 0x3c1   :  { %v489_v54 = vadd.f32 %v532_v52, %v488_v53  ;;  %v634_v55 = vpop.f32.mrb[5].mxu1 }
 0x3c2   :  { %v491_v56 = vpop.f32.mrb[6].mxu1 }
 0x3c3   :  { %494 = vst [vmem:[#allocation11] sm:$0xff] %v489_v54  ;;  %v635_v57 = vpop.f32.mrb[7].mxu1 }
 0x3c4   :  { %791 = shalt.err (!%p788_p2)
}
 0x3c5   :  { %s792_s8 = scalar_lea.hbm %s1005_s9, 128 }
 0x3c6   :  { %p793_p3 = scmp.ne.s32.totalorder %s1005_s9, %s792_s8  ;;  %p796_p4 = scmp.lt.u32.totalorder %s792_s8, %s1005_s9 }
 0x3c8   :  { %p798_p5 = pnand %p796_p4, %p793_p3 }
 0x3ca   :  { %801 = shalt.err (!%p798_p5)
}
 0x3cb   :  { %504 = dma.vmem_to_hbm [thread:$0]  %s502_s30, 128, %s1005_s9, [#allocation4]  }
 0x3cc   :  { %808 = dma.done.wait [#allocation4], 128  }
 0x3cd   :  { %809 = vsyncadd [#allocation4], 4294967168 }
 0x3ce   :  { %508 = vsyncpa [#allocation3], 1 }
 0x3cf   :  { %509 = vsyncpa [#allocation6], 1 }
 0x3d0   :  { %510 = vsyncpa [#allocation9], 1 }
 0x3d1   :  { %511 = vsyncpa [#allocation4], 1 }

</bundles_post_ra>
